<compile_context>
chip_gen: v6e
topology: v6e:2x2x1
jax: 0.10.0
libtpu: 0.0.40
codegen_flags: <defaults>
</compile_context>

<pallas_src>
import jax
import jax.numpy as jnp
from jax.experimental import pallas as pl
from jax.experimental.pallas import tpu as pltpu


def _heaviside_kernel(x_ref, o_ref):
    # Heaviside step in the input's native dtype; alpha only matters for the
    # (surrogate) backward and is intentionally absent here.
    o_ref[...] = (x_ref[...] >= 0).astype(o_ref.dtype)


def surrogate_forward(x, alpha=None):
    """Spike generation: (x >= 0) -> {0, 1}, returned in x.dtype.

    `alpha` is accepted for API parity with SurrogateFunctionBase but does not
    affect the forward value.
    """
    del alpha  # forward is independent of alpha (backward-only parameter)
    orig_shape = x.shape
    dtype = x.dtype
    total = x.size

    # ---- choose a lane-dense 2D slab (rows, lanes), lanes a multiple of 128 ----
    lanes = 128
    for cand in (4096, 2048, 1024, 512, 256):
        if total % cand == 0:
            lanes = cand
            break

    x_flat = x.reshape(-1)
    padded = 0
    if total % lanes != 0:
        # TODO(synk): could use a masked last block instead of this fallback pad
        padded = (-total) % lanes
        x_flat = jnp.pad(x_flat, (0, padded))
    rows = x_flat.size // lanes
    x2 = x_flat.reshape(rows, lanes)

    # ---- pick a big tile: ~1 MiB per operand; 2 arrays x 2 buffers ≈ 4 MiB VMEM ----
    target_tile_bytes = 1 << 20
    row_bytes = lanes * dtype.itemsize
    block_rows = max(1, target_tile_bytes // row_bytes)
    if block_rows >= rows:
        block_rows = rows                      # whole array in one block
    else:
        block_rows = max(8, (block_rows // 8) * 8)  # (8,128)-friendly tiles

    grid = (pl.cdiv(rows, block_rows),)

    out2 = pl.pallas_call(
        _heaviside_kernel,
        out_shape=jax.ShapeDtypeStruct((rows, lanes), dtype),
        grid=grid,
        in_specs=[pl.BlockSpec((block_rows, lanes), lambda i: (i, 0))],
        out_specs=pl.BlockSpec((block_rows, lanes), lambda i: (i, 0)),
        compiler_params=pltpu.CompilerParams(
            dimension_semantics=("parallel",),
        ),
    )(x2)

    out_flat = out2.reshape(-1)
    if padded:
        out_flat = out_flat[:total]
    return out_flat.reshape(orig_shape)


if __name__ == "__main__":
    key = jax.random.PRNGKey(0)
    # membrane potential input, NCHW, centered around 0
    x = jax.random.normal(key, (2, 4, 16, 16), dtype=jnp.float32)

    # parameter init matching nn.Parameter(torch.tensor(alpha)); backward-only
    alpha = 2.0

    spikes = surrogate_forward(x, alpha)
    spikes = jax.block_until_ready(spikes)

    ref = (x >= 0).astype(jnp.float32)
    assert spikes.shape == x.shape
    assert spikes.dtype == x.dtype
    assert bool(jnp.all(spikes == ref))

    print("KERNEL_OK")
</pallas_src>

<mosaic_0001>
module attributes {stable_mosaic.version = 11 : i64} {
  func.func @_heaviside_kernel(%arg0: i32, %arg1: memref<1x2048xf32, #tpu.memory_space<vmem>>, %arg2: memref<1x2048xf32, #tpu.memory_space<vmem>>) attributes {dimension_semantics = [#tpu.dimension_semantics<parallel>], iteration_bounds = array<i64: 1>, scalar_prefetch = 0 : i64, scratch_operands = 0 : i64, tpu.core_type = #tpu.core_type<tc>, window_params = [{transform_indices = @transform_0, window_bounds = array<i64: 1, 2048>}, {transform_indices = @transform_1, window_bounds = array<i64: 1, 2048>}]} {
    %c0 = arith.constant 0 : index
    %c0_0 = arith.constant 0 : index
    %0 = vector.load %arg1[%c0, %c0_0] : memref<1x2048xf32, #tpu.memory_space<vmem>>, vector<1x2048xf32>
    %cst = arith.constant 0.000000e+00 : f32
    %1 = vector.broadcast %cst : f32 to vector<1x2048xf32>
    %2 = arith.cmpf oge, %0, %1 : vector<1x2048xf32>
    %3 = arith.extui %2 : vector<1x2048xi1> to vector<1x2048xi32>
    %4 = arith.sitofp %3 : vector<1x2048xi32> to vector<1x2048xf32>
    %c0_1 = arith.constant 0 : index
    %c0_2 = arith.constant 0 : index
    %5 = vector.load %arg2[%c0_1, %c0_2] : memref<1x2048xf32, #tpu.memory_space<vmem>>, vector<1x2048xf32>
    tpu.vector_store %arg2[%c0_1, %c0_2], %4 {strides = array<i32>} : memref<1x2048xf32, #tpu.memory_space<vmem>>, vector<1x2048xf32>,
    return
  }
  func.func @transform_0(%arg0: i32) -> (i32, i32) {
    %c0_i32 = arith.constant 0 : i32
    %c0_i32_0 = arith.constant 0 : i32
    return %arg0, %c0_i32 : i32, i32
  }
  func.func @transform_1(%arg0: i32) -> (i32, i32) {
    %c0_i32 = arith.constant 0 : i32
    %c0_i32_0 = arith.constant 0 : i32
    return %arg0, %c0_i32 : i32, i32
  }
}

</mosaic_0001>

<bundles_post_ra>
// kernel: tpu_custom_call.1
= control target key start
LH: loop header
LB: loop body
LE: loop exit
PB: predicated region body
PF: predicated region fallthrough
CT: control target
= control target key end

     0   :  { %6 = vsyncpa [#allocation3], 0  ;;  %s114_s0 = inlined_call_operand.hbm [shape: f32[1,2048], index: 0, kind: input, shape index: {}]   ;;  %s115_s1 = inlined_call_operand.hbm [shape: f32[1,2048], index: 1, kind: output, shape index: {}]  }
   0x1   :  { %7 = vsyncpa [#allocation4], 0  ;;  %s95_s6 = smov [#allocation2]  }
   0x2   :  { %s14_s7 = sshll.u32 %s95_s6, 4  ;;  %s15_s7 = int_to_ptr.vmem [resolvable:$true] %s14_s7 }
   0x3   :  { %s59_s8 = scalar_lea.vmem %s15_s7, 256  ;;  %p64_p1 = scmp.lt.s32.totalorder %s15_s7, %s15_s7 }
   0x4   :  { %p60_p0 = scmp.ne.s32.totalorder %s15_s7, %s59_s8  ;;  %p65_p2 = scmp.lt.s32.totalorder %s59_s8, %s59_s8 }
   0x6   :  { %p66_p3 = por %p65_p2, %p64_p1 }
   0x8   :  { %p67_p4 = pnand %p66_p3, %p60_p0 }
   0xa   :  { %70 = shalt.err (!%p67_p4)
}
   0xb   :  { %17 = dma.hbm_to_vmem [thread:$0]  %s114_s0, 256, %s15_s7, [#allocation3]  }
   0xc   :  { %91 = dma.done.wait [#allocation3], 256  }
   0xd   :  { %92 = vsyncadd [#allocation3], 4294967040  ;;  %s96_s11 = smov [#allocation5]   ;;  %v21_v0 = vld [vmem:[#allocation2] sm:$0xff]  ;;  %v22_v1 = vld [vmem:[#allocation2 + $0x8] sm:$0xff]  ;;  %v97_v2 = vmov 0.0  }
   0xe   :  { %s37_s12 = sshll.u32 %s96_s11, 4  ;;  %vm23_vm0 = vcmp.ge.f32.partialorder %v21_v0, 0.0  ;;  %vm24_vm1 = vcmp.ge.f32.partialorder %v22_v1, 0.0  ;;  %s38_s12 = int_to_ptr.vmem [resolvable:$true] %s37_s12 }
   0xf   :  { %v46_v3 = vsel %vm23_vm0, 1.0, %v97_v2  ;;  %v47_v4 = vsel %vm24_vm1, 1.0, %v97_v2  ;;  %s71_s13 = scalar_lea.vmem %s38_s12, 256  ;;  %p76_p6 = scmp.lt.s32.totalorder %s38_s12, %s38_s12 }
  0x10   :  { %29 = vst [vmem:[#allocation5] sm:$0xff] %v46_v3  ;;  %30 = vst [vmem:[#allocation5 + $0x8] sm:$0xff] %v47_v4  ;;  %p72_p5 = scmp.ne.s32.totalorder %s38_s12, %s71_s13  ;;  %p77_p7 = scmp.lt.s32.totalorder %s71_s13, %s71_s13 }
  0x12   :  { %p78_p8 = por %p77_p7, %p76_p6 }
  0x14   :  { %p79_p9 = pnand %p78_p8, %p72_p5 }
  0x16   :  { %82 = shalt.err (!%p79_p9)
}
  0x17   :  { %40 = dma.vmem_to_hbm [thread:$0]  %s38_s12, 256, %s115_s1, [#allocation4]  }
  0x18   :  { %93 = dma.done.wait [#allocation4], 256  }
  0x19   :  { %94 = vsyncadd [#allocation4], 4294967040 }
  0x1a   :  { %44 = vsyncpa [#allocation3], 1 }
  0x1b   :  { %45 = vsyncpa [#allocation4], 1 }

</bundles_post_ra>
